<compile_context>
chip_gen: v7x
topology: tpu7x:2x2x1
jax: 0.10.0
libtpu: 0.0.40
codegen_flags: <defaults>
</compile_context>

<pallas_src>
import math
from functools import partial

import jax
import jax.numpy as jnp
from jax.experimental import pallas as pl
from jax.experimental.pallas import tpu as pltpu


# ---------------------------------------------------------------------------
# Small helpers
# ---------------------------------------------------------------------------

def _round_up(n, m):
    return ((n + m - 1) // m) * m


def _sublane(itemsize):
    # Native sublane packing of the second-to-last dim for this dtype width.
    return {4: 8, 2: 16, 1: 32}.get(itemsize, 8)


def _vmem_budget_bytes():
    """Scoped-VMEM budget per generation: ~100 MiB on 128 MiB parts
    (v5e/v6e), ~56 MiB on 64 MiB parts (v7x).  Conservative fallback if the
    hardware query is unavailable."""
    phys = 64 * 1024 * 1024
    try:
        phys = int(getattr(pltpu.get_tpu_info(), "vmem_capacity_bytes", phys))
    except Exception:
        pass
    return int(max(32 * 1024 * 1024,
                   min(phys - 8 * 1024 * 1024, 100 * 1024 * 1024)))


_VMEM_BUDGET = _vmem_budget_bytes()


def _gelu_exact(x):
    # Matches torch.nn.GELU() default (erf formulation), computed in f32.
    return 0.5 * x * (1.0 + jax.lax.erf(x * (1.0 / math.sqrt(2.0))))


# ---------------------------------------------------------------------------
# Tile planning (runs at trace time on static shapes)
# ---------------------------------------------------------------------------

def _row_tile_candidates(M, sub):
    """Largest-first row-tile candidates, aligned to `sub`, never padding a
    small/decode-sized M up to a huge fixed tile."""
    cap = min(1024, _round_up(M, 256))       # cap padding waste at < 256 rows
    cap = min(cap, _round_up(M, sub))        # ... and never beyond the next sublane multiple
    cap = max(sub, _round_up(cap, sub))
    cands = []
    t = cap
    while True:
        cands.append(t)
        if t <= sub:
            break
        t = max(sub, _round_up(t // 2, sub))
    return cands


def _pick_hidden_tile(H, th_max):
    """Largest divisor of H that is a multiple of 128 and <= th_max.
    (The hidden tile is the lane dim of the W1 slab and the sublane dim of
    the W2 slab, so it must be a multiple of 128 or equal to H.)"""
    if H % 128 != 0:
        return H                              # only legal block extent
    t = (min(th_max, H) // 128) * 128
    while t >= 128:
        if H % t == 0:
            return t
        t -= 128
    return H


def _plan(M, C, H, itemsize, *, budget, force_streamed, th_max):
    """Returns ("resident", tm, H) or ("tiled", tm, th)."""
    sub = _sublane(itemsize)
    avail = budget - 2 * 1024 * 1024          # headroom for compiler scratch

    if not force_streamed:
        # Weights-resident path.  Constant index maps mean the pipeline DMAs
        # the weights exactly once; allocation is still double-buffered, so
        # budget 2x here (we deliberately avoid pl.Buffered(1) for safety).
        w_bytes = 2 * (C * H + H * C + H + C) * itemsize
        for tm in _row_tile_candidates(M, sub):
            # x + out double buffers, f32 hidden temp, hidden recast for MXU2.
            act_bytes = tm * (4 * C * itemsize + H * (4 + itemsize))
            if w_bytes + act_bytes <= avail:
                return ("resident", tm, H)

    # Streamed fallback: tile the hidden (reduction) dim.
    th = _pick_hidden_tile(H, th_max)
    while True:
        for tm in _row_tile_candidates(M, sub):
            wslab = 2 * (C * th + th * C + th + C) * itemsize
            act = tm * (4 * C * itemsize + 4 * C + th * (4 + itemsize))
            if wslab + act <= avail:
                return ("tiled", tm, th)
        th_next = _pick_hidden_tile(H, max(128, th // 2)) if th > 128 else th
        if th_next == th:
            return ("tiled", sub, th)          # best effort
        th = th_next


# ---------------------------------------------------------------------------
# Kernels
# ---------------------------------------------------------------------------

def _ffn_tile(x_ref, w1_ref, b1_ref, w2_ref):
    # x @ W1 (+b1) -> exact GELU -> (cast to weight dtype) @ W2.
    # Operands go to the MXU in their native dtype; accumulation is f32.
    h = jnp.dot(x_ref[...], w1_ref[...], preferred_element_type=jnp.float32)
    h = _gelu_exact(h + b1_ref[...].astype(jnp.float32))
    return jnp.dot(h.astype(w2_ref.dtype), w2_ref[...],
                   preferred_element_type=jnp.float32)


def mlp_kernel_resident(x_ref, w1_ref, b1_ref, w2_ref, b2_ref, o_ref):
    # Weights resident in VMEM; one grid step per row tile, no reduction axis.
    y = _ffn_tile(x_ref, w1_ref, b1_ref, w2_ref) + b2_ref[...].astype(jnp.float32)
    # TODO(synk): dropout is identity in eval mode; training-mode dropout
    # would need pltpu.prng_seed / pltpu.prng_random_bits + masking here.
    o_ref[...] = y.astype(o_ref.dtype)


def mlp_kernel_tiled_f32(x_ref, w1_ref, b1_ref, w2_ref, b2_ref, o_ref):
    # f32 output: the resident output block IS the accumulator (no scratch).
    @pl.when(pl.program_id(1) == 0)
    def _():
        o_ref[...] = jnp.broadcast_to(b2_ref[...].astype(jnp.float32),
                                      o_ref.shape)

    o_ref[...] += _ffn_tile(x_ref, w1_ref, b1_ref, w2_ref)


def mlp_kernel_tiled_acc(x_ref, w1_ref, b1_ref, w2_ref, b2_ref, o_ref, acc_ref):
    # Sub-32-bit output: accumulate in an f32 scratch, cast+store at the end.
    j = pl.program_id(1)

    @pl.when(j == 0)
    def _():
        acc_ref[...] = jnp.broadcast_to(b2_ref[...].astype(jnp.float32),
                                        acc_ref.shape)

    acc_ref[...] += _ffn_tile(x_ref, w1_ref, b1_ref, w2_ref)

    @pl.when(j == pl.num_programs(1) - 1)
    def _():
        o_ref[...] = acc_ref[...].astype(o_ref.dtype)


# ---------------------------------------------------------------------------
# Wrapper
# ---------------------------------------------------------------------------

@partial(jax.jit, static_argnames=("force_streamed", "th_max"))
def mlp_forward(x, w1, b1, w2, b2, *, force_streamed=False, th_max=1024):
    """x: (B, T, C). Weights stored as (in, out) so the kernel does x @ W."""
    B, T, C = x.shape
    H = w1.shape[1]
    M = B * T
    itemsize = jnp.dtype(x.dtype).itemsize

    mode, tm, th = _plan(M, C, H, itemsize, budget=_VMEM_BUDGET,
                         force_streamed=force_streamed, th_max=th_max)

    M_pad = _round_up(M, tm)
    x2 = x.reshape(M, C)
    if M_pad != M:
        x2 = jnp.pad(x2, ((0, M_pad - M), (0, 0)))

    cost = pl.CostEstimate(
        flops=4 * M_pad * C * H,                       # two matmuls
        transcendentals=M_pad * H,                     # erf
        bytes_accessed=(2 * M * C + C * H + H * C + H + C) * itemsize,
    )

    if mode == "resident":
        grid = (M_pad // tm,)
        in_specs = [
            pl.BlockSpec((tm, C), lambda i: (i, 0)),   # x rows stream over i
            pl.BlockSpec((C, H), lambda i: (0, 0)),    # W1 resident (DMA once)
            pl.BlockSpec((1, H), lambda i: (0, 0)),    # b1 resident
            pl.BlockSpec((H, C), lambda i: (0, 0)),    # W2 resident
            pl.BlockSpec((1, C), lambda i: (0, 0)),    # b2 resident
        ]
        out_spec = pl.BlockSpec((tm, C), lambda i: (i, 0))
        kernel = mlp_kernel_resident
        scratch = []
        semantics = ("parallel",)
    else:
        grid = (M_pad // tm, H // th)                  # reduction axis last
        in_specs = [
            pl.BlockSpec((tm, C), lambda i, j: (i, 0)),   # x (reused over j)
            pl.BlockSpec((C, th), lambda i, j: (0, j)),   # W1 slab (streams)
            pl.BlockSpec((1, th), lambda i, j: (0, j)),   # b1 slab
            pl.BlockSpec((th, C), lambda i, j: (j, 0)),   # W2 slab (streams)
            pl.BlockSpec((1, C), lambda i, j: (0, 0)),    # b2 (tiny, constant)
        ]
        out_spec = pl.BlockSpec((tm, C), lambda i, j: (i, 0))
        if x.dtype == jnp.float32:
            kernel = mlp_kernel_tiled_f32
            scratch = []
        else:
            kernel = mlp_kernel_tiled_acc
            scratch = [pltpu.VMEM((tm, C), jnp.float32)]
        semantics = ("parallel", "arbitrary")

    out = pl.pallas_call(
        kernel,
        out_shape=jax.ShapeDtypeStruct((M_pad, C), x.dtype),
        grid_spec=pltpu.PrefetchScalarGridSpec(
            num_scalar_prefetch=0,
            grid=grid,
            in_specs=in_specs,
            out_specs=out_spec,
            scratch_shapes=scratch,
        ),
        compiler_params=pltpu.CompilerParams(
            dimension_semantics=semantics,
            vmem_limit_bytes=_VMEM_BUDGET,
        ),
        cost_estimate=cost,
    )(x2, w1, b1, w2, b2)

    if M_pad != M:
        out = out[:M]
    return out.reshape(B, T, C)


# ---------------------------------------------------------------------------
# Reference + self-test
# ---------------------------------------------------------------------------

def mlp_reference(x, w1, b1, w2, b2):
    x32 = x.astype(jnp.float32)
    h = jnp.dot(x32, w1.astype(jnp.float32)) + b1.astype(jnp.float32)
    h = _gelu_exact(h)
    return jnp.dot(h, w2.astype(jnp.float32)) + b2.astype(jnp.float32)


def _make_params(key, C, H):
    k1, k2, k3, k4 = jax.random.split(key, 4)
    bound1 = 1.0 / math.sqrt(C)
    w1 = jax.random.uniform(k1, (C, H), minval=-bound1, maxval=bound1,
                            dtype=jnp.float32)
    b1 = jax.random.uniform(k2, (1, H), minval=-bound1, maxval=bound1,
                            dtype=jnp.float32)
    bound2 = 1.0 / math.sqrt(H)
    w2 = jax.random.uniform(k3, (H, C), minval=-bound2, maxval=bound2,
                            dtype=jnp.float32)
    b2 = jax.random.uniform(k4, (1, C), minval=-bound2, maxval=bound2,
                            dtype=jnp.float32)
    return w1, b1, w2, b2


if __name__ == "__main__":
    key = jax.random.PRNGKey(0)
    key_a, key_b, kxa, kxb = jax.random.split(key, 4)

    # --- Config A: n_embd=32 (hidden 128). Exercises the weights-resident path.
    B, T, C = 2, 8, 32
    H = 4 * C
    x = jax.random.normal(kxa, (B, T, C), dtype=jnp.float32)
    w1, b1, w2, b2 = _make_params(key_a, C, H)
    y_ref = mlp_reference(x, w1, b1, w2, b2)

    y = mlp_forward(x, w1, b1, w2, b2)
    jax.block_until_ready(y)
    assert y.shape == (B, T, C)
    assert jnp.allclose(y, y_ref, atol=1e-5, rtol=1e-5), "A/f32 mismatch"

    xb, w1b, b1b, w2b, b2b = (a.astype(jnp.bfloat16) for a in (x, w1, b1, w2, b2))
    yb = mlp_forward(xb, w1b, b1b, w2b, b2b)
    jax.block_until_ready(yb)
    assert yb.dtype == jnp.bfloat16 and yb.shape == (B, T, C)
    assert jnp.allclose(yb.astype(jnp.float32), y_ref, atol=5e-2, rtol=5e-2), \
        "A/bf16 mismatch"

    # --- Config B: n_embd=128 (hidden 512), forced hidden-tiled streaming path
    # (th=128 -> 4 reduction steps) to exercise accumulator init/finalize.
    B2, T2, C2 = 2, 8, 128
    H2 = 4 * C2
    x2 = jax.random.normal(kxb, (B2, T2, C2), dtype=jnp.float32)
    w1_2, b1_2, w2_2, b2_2 = _make_params(key_b, C2, H2)
    y2_ref = mlp_reference(x2, w1_2, b1_2, w2_2, b2_2)

    y2 = mlp_forward(x2, w1_2, b1_2, w2_2, b2_2, force_streamed=True, th_max=128)
    jax.block_until_ready(y2)
    assert jnp.allclose(y2, y2_ref, atol=1e-5, rtol=1e-5), "B/f32 mismatch"

    x2b, w1_2b, b1_2b, w2_2b, b2_2b = (a.astype(jnp.bfloat16)
                                       for a in (x2, w1_2, b1_2, w2_2, b2_2))
    y2b = mlp_forward(x2b, w1_2b, b1_2b, w2_2b, b2_2b,
                      force_streamed=True, th_max=128)
    jax.block_until_ready(y2b)
    assert jnp.allclose(y2b.astype(jnp.float32), y2_ref, atol=5e-2, rtol=5e-2), \
        "B/bf16 mismatch"

    print("KERNEL_OK")
</pallas_src>

<mosaic_0001>
module attributes {stable_mosaic.version = 11 : i64} {
  func.func @mlp_kernel_resident(%arg0: i32, %arg1: memref<16x32xf32, #tpu.memory_space<vmem>>, %arg2: memref<32x128xf32, #tpu.memory_space<vmem>>, %arg3: memref<1x128xf32, #tpu.memory_space<vmem>>, %arg4: memref<128x32xf32, #tpu.memory_space<vmem>>, %arg5: memref<1x32xf32, #tpu.memory_space<vmem>>, %arg6: memref<16x32xf32, #tpu.memory_space<vmem>>) attributes {dimension_semantics = [#tpu.dimension_semantics<parallel>], iteration_bounds = array<i64: 1>, scalar_prefetch = 0 : i64, scratch_operands = 0 : i64, tpu.core_type = #tpu.core_type<tc>, window_params = [{transform_indices = @transform_0, window_bounds = array<i64: 16, 32>}, {pipeline_mode = #tpu.pipeline_mode<synchronous>, transform_indices = @transform_1, window_bounds = array<i64: 32, 128>}, {pipeline_mode = #tpu.pipeline_mode<synchronous>, transform_indices = @transform_2, window_bounds = array<i64: 1, 128>}, {pipeline_mode = #tpu.pipeline_mode<synchronous>, transform_indices = @transform_3, window_bounds = array<i64: 128, 32>}, {pipeline_mode = #tpu.pipeline_mode<synchronous>, transform_indices = @transform_4, window_bounds = array<i64: 1, 32>}, {transform_indices = @transform_5, window_bounds = array<i64: 16, 32>}]} {
    %c0 = arith.constant 0 : index
    %c0_0 = arith.constant 0 : index
    %0 = vector.load %arg1[%c0, %c0_0] : memref<16x32xf32, #tpu.memory_space<vmem>>, vector<16x32xf32>
    %c0_1 = arith.constant 0 : index
    %c0_2 = arith.constant 0 : index
    %1 = vector.load %arg2[%c0_1, %c0_2] : memref<32x128xf32, #tpu.memory_space<vmem>>, vector<32x128xf32>
    %cst = arith.constant dense<0.000000e+00> : vector<16x128xf32>
    %2 = tpu.matmul %0, %1, %cst {dimension_numbers = #tpu.dot_dimension_numbers<[1], [0], [0], [1], [0, 0, 1, 1], [], []>} : vector<16x32xf32>, vector<32x128xf32>, vector<16x128xf32> -> vector<16x128xf32>
    %c0_3 = arith.constant 0 : index
    %c0_4 = arith.constant 0 : index
    %3 = vector.load %arg3[%c0_3, %c0_4] : memref<1x128xf32, #tpu.memory_space<vmem>>, vector<1x128xf32>
    %4 = vector.broadcast %3 : vector<1x128xf32> to vector<16x128xf32>
    %5 = arith.addf %2, %4 : vector<16x128xf32>
    %cst_5 = arith.constant 5.000000e-01 : f32
    %6 = vector.broadcast %cst_5 : f32 to vector<16x128xf32>
    %7 = arith.mulf %6, %5 : vector<16x128xf32>
    %cst_6 = arith.constant 0.707106769 : f32
    %8 = vector.broadcast %cst_6 : f32 to vector<16x128xf32>
    %9 = arith.mulf %5, %8 : vector<16x128xf32>
    %10 = math.erf %9 : vector<16x128xf32>
    %cst_7 = arith.constant 1.000000e+00 : f32
    %11 = vector.broadcast %cst_7 : f32 to vector<16x128xf32>
    %12 = arith.addf %11, %10 : vector<16x128xf32>
    %13 = arith.mulf %7, %12 : vector<16x128xf32>
    %c0_8 = arith.constant 0 : index
    %c0_9 = arith.constant 0 : index
    %14 = vector.load %arg4[%c0_8, %c0_9] : memref<128x32xf32, #tpu.memory_space<vmem>>, vector<128x32xf32>
    %cst_10 = arith.constant dense<0.000000e+00> : vector<16x32xf32>
    %15 = tpu.matmul %13, %14, %cst_10 {dimension_numbers = #tpu.dot_dimension_numbers<[1], [0], [0], [1], [0, 0, 1, 1], [], []>} : vector<16x128xf32>, vector<128x32xf32>, vector<16x32xf32> -> vector<16x32xf32>
    %c0_11 = arith.constant 0 : index
    %c0_12 = arith.constant 0 : index
    %16 = vector.load %arg5[%c0_11, %c0_12] : memref<1x32xf32, #tpu.memory_space<vmem>>, vector<1x32xf32>
    %17 = vector.broadcast %16 : vector<1x32xf32> to vector<16x32xf32>
    %18 = arith.addf %15, %17 : vector<16x32xf32>
    %c0_13 = arith.constant 0 : index
    %c0_14 = arith.constant 0 : index
    %19 = vector.load %arg6[%c0_13, %c0_14] : memref<16x32xf32, #tpu.memory_space<vmem>>, vector<16x32xf32>
    tpu.vector_store %arg6[%c0_13, %c0_14], %18 {strides = array<i32>} : memref<16x32xf32, #tpu.memory_space<vmem>>, vector<16x32xf32>,
    return
  }
  func.func @transform_0(%arg0: i32) -> (i32, i32) {
    %c0_i32 = arith.constant 0 : i32
    %c0_i32_0 = arith.constant 0 : i32
    return %arg0, %c0_i32 : i32, i32
  }
  func.func @transform_1(%arg0: i32) -> (i32, i32) {
    %c0_i32 = arith.constant 0 : i32
    %c0_i32_0 = arith.constant 0 : i32
    %c0_i32_1 = arith.constant 0 : i32
    return %c0_i32, %c0_i32_0 : i32, i32
  }
  func.func @transform_2(%arg0: i32) -> (i32, i32) {
    %c0_i32 = arith.constant 0 : i32
    %c0_i32_0 = arith.constant 0 : i32
    %c0_i32_1 = arith.constant 0 : i32
    return %c0_i32, %c0_i32_0 : i32, i32
  }
  func.func @transform_3(%arg0: i32) -> (i32, i32) {
    %c0_i32 = arith.constant 0 : i32
    %c0_i32_0 = arith.constant 0 : i32
    %c0_i32_1 = arith.constant 0 : i32
    return %c0_i32, %c0_i32_0 : i32, i32
  }
  func.func @transform_4(%arg0: i32) -> (i32, i32) {
    %c0_i32 = arith.constant 0 : i32
    %c0_i32_0 = arith.constant 0 : i32
    %c0_i32_1 = arith.constant 0 : i32
    return %c0_i32, %c0_i32_0 : i32, i32
  }
  func.func @transform_5(%arg0: i32) -> (i32, i32) {
    %c0_i32 = arith.constant 0 : i32
    %c0_i32_0 = arith.constant 0 : i32
    return %arg0, %c0_i32 : i32, i32
  }
}

</mosaic_0001>

<bundles_post_ra>
// kernel: mlp_forward.1
= control target key start
LH: loop header
LB: loop body
LE: loop exit
PB: predicated region body
PF: predicated region fallthrough
CT: control target
= control target key end

     0   :  { %vm34_vm0 = vcmask 261120   ;;  %s508_s0 = inlined_call_operand.vmem [shape: f32[16,32], index: 0, kind: input, shape index: {}]   ;;  %s509_s1 = inlined_call_operand.vmem [shape: f32[32,128], index: 1, kind: input, shape index: {}]   ;;  %s510_s2 = inlined_call_operand.vmem [shape: f32[1,128], index: 2, kind: input, shape index: {}]   ;;  %s511_s3 = inlined_call_operand.vmem [shape: f32[128,32], index: 3, kind: input, shape index: {}]   ;;  %s512_s4 = inlined_call_operand.vmem [shape: f32[1,32], index: 4, kind: input, shape index: {}]   ;;  %s513_s5 = inlined_call_operand.hbm [shape: f32[16,32], index: 5, kind: output, shape index: {}]  }
   0x1   :  { %v23_v0 = vld [vmem:[%s509_s1] sm:$0xff]  ;;  %v24_v1 = vld [vmem:[%s509_s1 + $0x8] sm:$0xff]  ;;  %v25_v2 = vld [vmem:[%s509_s1 + $0x10] sm:$0xff] }
   0x2   :  { %v316_v3 = vpack.c.bf16 %v24_v1, %v23_v0  ;;  %v26_v4 = vld [vmem:[%s509_s1 + $0x18] sm:$0xff]  ;;  %v21_v5 = vld [vmem:[%s508_s0] sm:$0xff]  ;;  %v127_v8 = vld [vmem:[%s511_s3 + $0x8] sm:$0xff] }
   0x3   :  { %v320_v6 = vpack.c.bf16 %v26_v4, %v25_v2  ;;  %278 = vmatprep.mubr.msk.f32.mxu0 %vm34_vm0, %v21_v5  ;;  %v126_v7 = vld [vmem:[%s511_s3] sm:$0xff]  ;;  %v128_v9 = vld [vmem:[%s511_s3 + $0x10] sm:$0xff]  ;;  %v129_v11 = vld [vmem:[%s511_s3 + $0x18] sm:$0xff] }
   0x4   :  { %317 = vmatprep.subr.bf16.mxu0 %v316_v3  ;;  %v324_v10 = vpack.c.bf16 %v127_v8, %v126_v7  ;;  %v328_v12 = vpack.c.bf16 %v129_v11, %v128_v9  ;;  %v130_v13 = vld [vmem:[%s511_s3 + $0x20] sm:$0xff]  ;;  %v131_v14 = vld [vmem:[%s511_s3 + $0x28] sm:$0xff] }
   0x5   :  { %319 = vmatpush3.bf16.msra.mxu0 %v316_v3 }
   0x6   :  { %10 = vsyncpa [#allocation3], 0  ;;  %321 = vmatprep.subr.bf16.mxu0 %v320_v6  ;;  %325 = vmatprep.subr.bf16.mxu1 %v324_v10  ;;  %v332_v15 = vpack.c.bf16 %v131_v14, %v130_v13  ;;  %v22_v16 = vld [vmem:[%s508_s0 + $0x8] sm:$0xff]  ;;  %v132_v17 = vld [vmem:[%s511_s3 + $0x30] sm:$0xff]  ;;  %s387_s11 = smov [#allocation2]  }
   0x7   :  { %327 = vmatpush3.bf16.msra.mxu1 %v324_v10  ;;  %v133_v18 = vld [vmem:[%s511_s3 + $0x38] sm:$0xff]  ;;  %v134_v20 = vld [vmem:[%s511_s3 + $0x40] sm:$0xff]  ;;  %v135_v21 = vld [vmem:[%s511_s3 + $0x48] sm:$0xff]  ;;  %s231_s12 = sshll.u32 %s387_s11, 4  ;;  %s232_s12 = int_to_ptr.vmem [resolvable:$true] %s231_s12 }
   0x8   :  { %329 = vmatprep.subr.bf16.mxu1 %v328_v12  ;;  %v336_v19 = vpack.c.bf16 %v133_v18, %v132_v17  ;;  %v340_v22 = vpack.c.bf16 %v135_v21, %v134_v20  ;;  %v136_v23 = vld [vmem:[%s511_s3 + $0x50] sm:$0xff]  ;;  %v137_v24 = vld [vmem:[%s511_s3 + $0x58] sm:$0xff]  ;;  %v138_v26 = vld [vmem:[%s511_s3 + $0x60] sm:$0xff]  ;;  %s363_s13 = scalar_lea.vmem %s232_s12, 256  ;;  %p368_p1 = scmp.lt.s32.totalorder %s232_s12, %s232_s12 }
   0x9   :  { %323 = vmatpush3.bf16.msra.mxu0 %v320_v6  ;;  %v344_v25 = vpack.c.bf16 %v137_v24, %v136_v23  ;;  %v139_v27 = vld [vmem:[%s511_s3 + $0x68] sm:$0xff]  ;;  %v140_v29 = vld [vmem:[%s511_s3 + $0x70] sm:$0xff]  ;;  %v141_v30 = vld [vmem:[%s511_s3 + $0x78] sm:$0xff]  ;;  %p364_p0 = scmp.ne.s32.totalorder %s232_s12, %s363_s13  ;;  %p369_p2 = scmp.lt.s32.totalorder %s363_s13, %s363_s13 }
   0xa   :  { %v348_v28 = vpack.c.bf16 %v139_v27, %v138_v26  ;;  %v352_v31 = vpack.c.bf16 %v141_v30, %v140_v29  ;;  %v242_v32 = vld [vmem:[%s510_s2] ss:$0 sm:$0xff] }
   0xb   :  { %331 = vmatpush3.bf16.msra.mxu1 %v328_v12  ;;  %v245_v47 = vld [vmem:[%s512_s4] ss:$0 sm:$0xff]  ;;  %p370_p3 = por %p369_p2, %p368_p1 }
   0xc   :  { %279 = vmatmul.mubr.msk.f32.vlgmr.msra.gmra.mrb[0].mxu0 %vm34_vm0, %v22_v16  ;;  %333 = vmatprep.subr.bf16.mxu1 %v332_v15 }
   0xd   :  { %p371_p4 = pnand %p370_p3, %p364_p0 }
   0xf   :  { %335 = vmatpush3.bf16.msra.mxu1 %v332_v15 }
  0x10   :  { %337 = vmatprep.subr.bf16.mxu1 %v336_v19 }
  0x13   :  { %339 = vmatpush3.bf16.msra.mxu1 %v336_v19 }
  0x14   :  { %341 = vmatprep.subr.bf16.mxu1 %v340_v22 }
  0x17   :  { %343 = vmatpush3.bf16.msra.mxu1 %v340_v22 }
  0x18   :  { %345 = vmatprep.subr.bf16.mxu1 %v344_v25 }
  0x1b   :  { %347 = vmatpush3.bf16.msra.mxu1 %v344_v25 }
  0x1c   :  { %349 = vmatprep.subr.bf16.mxu1 %v348_v28 }
  0x1f   :  { %351 = vmatpush3.bf16.msra.mxu1 %v348_v28 }
  0x20   :  { %353 = vmatprep.subr.bf16.mxu1 %v352_v31 }
  0x23   :  { %355 = vmatpush3.bf16.msra.mxu1 %v352_v31 }
  0xdf   :  { %v280_v33 = vpop.f32.mrb[0].mxu0 }
  0xe0   :  { %v113_v34 = vadd.f32 %v280_v33, %v242_v32  ;;  %v107_v35 = vpop.f32.mrb[1].mxu0 }
  0xe1   :  { %v108_v36 = vadd.f32 %v242_v32, %v107_v35 }
  0xe2   :  { %v119_v37 = vmul.f32 0.70710677, %v113_v34  ;;  %v117_v44 = vmul.f32 0.5, %v113_v34 }
  0xe3   :  { %v118_v38 = vmul.f32 0.70710677, %v108_v36  ;;  %v116_v42 = vmul.f32 0.5, %v108_v36 }
  0xe4   :  { %359 = verf.f32 %v119_v37 }
  0xe5   :  { %361 = verf.f32 %v118_v38 }
  0xee   :  { %v360_v39 = vpop.eup %359 }
  0xef   :  { %v362_v40 = vpop.eup %361  ;;  %v123_v41 = vadd.f32 1.0, %v360_v39 }
  0xf0   :  { %v122_v43 = vadd.f32 1.0, %v362_v40 }
  0xf1   :  { %v125_v46 = vmul.f32 %v123_v41, %v117_v44 }
  0xf2   :  { %v124_v45 = vmul.f32 %v122_v43, %v116_v42 }
  0xf4   :  { %313 = vmatprep.mubr.f32.mxu1 %v124_v45 }
  0xf5   :  { %314 = vmatmul.mubr.f32.vlgmr.msra.gmra.mrb[0].mxu1 %v125_v46 }
 0x1c8   :  { %v315_v48 = vpop.f32.mrb[0].mxu1 }
 0x1c9   :  { %v221_v49 = vadd.f32 %v315_v48, %v245_v47  ;;  %v215_v50 = vpop.f32.mrb[1].mxu1 }
 0x1ca   :  { %v216_v51 = vadd.f32 %v245_v47, %v215_v50 }
 0x1cb   :  { %225 = vst.msk [vmem:[#allocation2 + $0x8] sm:$0xff] %vm34_vm0, %v221_v49 }
 0x1cc   :  { %224 = vst.msk [vmem:[#allocation2] sm:$0xff] %vm34_vm0, %v216_v51 }
 0x1cd   :  { %374 = shalt.err (!%p371_p4)
}
 0x1ce   :  { %s375_s15 = scalar_lea.hbm %s513_s5, 256 }
 0x1cf   :  { %p376_p5 = scmp.ne.s32.totalorder %s513_s5, %s375_s15  ;;  %p379_p6 = scmp.lt.u32.totalorder %s375_s15, %s513_s5 }
 0x1d1   :  { %p381_p7 = pnand %p379_p6, %p376_p5 }
 0x1d3   :  { %384 = shalt.err (!%p381_p7)
}
 0x1d4   :  { %s388_s20 = smov 128   ;;  %s389_s21 = smov 8  }
 0x1d5   :  { %237 = dma.vmem_to_hbm [thread:$0]  %s232_s12, 256, %s513_s5, [#allocation3], %s388_s20, %s388_s20, %s389_s21  }
 0x1d6   :  { %385 = dma.done.wait [#allocation3], 256  }
 0x1d7   :  { %386 = vsyncadd [#allocation3], 4294967040 }
 0x1d8   :  { %241 = vsyncpa [#allocation3], 1 }

</bundles_post_ra>
